<compile_context>
chip_gen: v7x
topology: tpu7x:2x2x1
jax: 0.10.0
libtpu: 0.0.40
codegen_flags: <defaults>
</compile_context>

<pallas_src>
import functools

import jax
import jax.numpy as jnp
from jax.experimental import pallas as pl
from jax.experimental.pallas import tpu as pltpu


def _senti_blocks_kernel(q_ref, x_ref, hm_ref,
                         wq_ref, bq_ref, wk_ref, bk_ref, wv_ref, bv_ref,
                         wo_ref, bo_ref, ln1g_ref, ln1b_ref,
                         w1_ref, b1_ref, w2_ref, b2_ref, ln2g_ref, ln2b_ref,
                         y_ref, attn_ref, q_acc,
                         *, num_heads, b_tile, seq_len):
    li = pl.program_id(1)                     # layer index (innermost, "arbitrary")
    D = q_ref.shape[-1]
    dh = D // num_heads
    scale = 1.0 / jnp.sqrt(jnp.float32(dh))

    # Initialize the carried query at the first layer of every batch tile.
    @pl.when(li == 0)
    def _init():
        q_acc[...] = jnp.broadcast_to(q_ref[...], (b_tile, D)).astype(jnp.float32)

    q = q_acc[...]                                        # (Bt, D)  f32
    x = x_ref[...].astype(jnp.float32)                    # (Bt*L, D)

    # ---- QKV projections (pre-transposed weights, batched M rows) ----
    qh = jnp.dot(q, wq_ref[0], preferred_element_type=jnp.float32) + bq_ref[0]
    kh = jnp.dot(x, wk_ref[0], preferred_element_type=jnp.float32) + bk_ref[0]
    vh = jnp.dot(x, wv_ref[0], preferred_element_type=jnp.float32) + bv_ref[0]
    kh3 = kh.reshape(b_tile, seq_len, D)                  # major-dim split only
    vh3 = vh.reshape(b_tile, seq_len, D)

    # ---- per-head attention in (Bt, H, L) layout ----
    hm = hm_ref[...]                                      # (H, D): 1 iff dim d in head h
    qh_h = qh[:, None, :] * hm[None, :, :]                # (Bt, H, D)
    scores = jnp.einsum('bhd,bld->bhl', qh_h, kh3,
                        preferred_element_type=jnp.float32) * scale   # (Bt, H, L)

    m = jnp.max(scores, axis=-1, keepdims=True)
    p = jnp.exp(scores - m)
    denom = jnp.sum(p, axis=-1, keepdims=True)
    probs = p * pl.reciprocal(denom, approx=True)         # (Bt, H, L)

    ctx_h = jnp.einsum('bhl,bld->bhd', probs, vh3,
                       preferred_element_type=jnp.float32)             # (Bt, H, D)
    ctx = jnp.sum(ctx_h * hm[None, :, :], axis=1)         # (Bt, D) concat-heads
    attn_avg = jnp.mean(probs, axis=1)                    # (Bt, L)  head-averaged

    attn_out = jnp.dot(ctx, wo_ref[0], preferred_element_type=jnp.float32) + bo_ref[0]

    # ---- residual + LayerNorm 1 ----
    h1 = q + attn_out
    mu1 = jnp.mean(h1, axis=-1, keepdims=True)
    var1 = jnp.mean((h1 - mu1) ** 2, axis=-1, keepdims=True)
    h1n = (h1 - mu1) * jax.lax.rsqrt(var1 + 1e-5) * ln1g_ref[0] + ln1b_ref[0]

    # ---- FFN ----
    f = jnp.dot(h1n, w1_ref[0], preferred_element_type=jnp.float32) + b1_ref[0]
    f = jnp.maximum(f, 0.0)
    f = jnp.dot(f, w2_ref[0], preferred_element_type=jnp.float32) + b2_ref[0]

    # ---- residual + LayerNorm 2 ----
    h2 = h1n + f
    mu2 = jnp.mean(h2, axis=-1, keepdims=True)
    var2 = jnp.mean((h2 - mu2) ** 2, axis=-1, keepdims=True)
    h2n = (h2 - mu2) * jax.lax.rsqrt(var2 + 1e-5) * ln2g_ref[0] + ln2b_ref[0]

    # Carry the updated query to the next layer.
    q_acc[...] = h2n

    # Emit outputs only once, on the last layer.
    @pl.when(li == pl.num_programs(1) - 1)
    def _store():
        y_ref[...] = h2n.astype(y_ref.dtype)
        attn_ref[...] = attn_avg.astype(attn_ref.dtype)


def init_params(key, layer_num, hid_dim, ffn_dim, dtype=jnp.float32):
    keys = jax.random.split(key, 1 + layer_num)
    # _Q = nn.Linear(1, hidDim, bias=False): weight shape (hidDim, 1)
    params = {"q_w": 0.02 * jax.random.normal(keys[0], (hid_dim, 1), dtype)}
    layers = []
    for i in range(layer_num):
        ks = jax.random.split(keys[1 + i], 6)
        layers.append({
            "wq": 0.02 * jax.random.normal(ks[0], (hid_dim, hid_dim), dtype),
            "bq": jnp.zeros((1, hid_dim), dtype),
            "wk": 0.02 * jax.random.normal(ks[1], (hid_dim, hid_dim), dtype),
            "bk": jnp.zeros((1, hid_dim), dtype),
            "wv": 0.02 * jax.random.normal(ks[2], (hid_dim, hid_dim), dtype),
            "bv": jnp.zeros((1, hid_dim), dtype),
            "wo": 0.02 * jax.random.normal(ks[3], (hid_dim, hid_dim), dtype),
            "bo": jnp.zeros((1, hid_dim), dtype),
            "ln1g": jnp.ones((1, hid_dim), dtype),
            "ln1b": jnp.zeros((1, hid_dim), dtype),
            "w1": 0.02 * jax.random.normal(ks[4], (ffn_dim, hid_dim), dtype),
            "b1": jnp.zeros((1, ffn_dim), dtype),
            "w2": 0.02 * jax.random.normal(ks[5], (hid_dim, ffn_dim), dtype),
            "b2": jnp.zeros((1, hid_dim), dtype),
            "ln2g": jnp.ones((1, hid_dim), dtype),
            "ln2b": jnp.zeros((1, hid_dim), dtype),
        })
    params["layers"] = layers
    return params


@functools.partial(jax.jit, static_argnames=("num_heads", "return_attn_weight"))
def senti_classifier_forward(last_hidden_state, params, *, num_heads,
                             return_attn_weight=True):
    """Equivalent of SentiClassifier.forward(x, returnAttnWeight=True)."""
    B, L, D = last_hidden_state.shape
    layers = params["layers"]
    n_layers = len(layers)
    assert D % num_heads == 0

    # --- stack per-layer weights (leading layer axis), pre-transpose to (in, out) ---
    def stack(name, transpose):
        arrs = [jnp.transpose(p[name]) if transpose else p[name] for p in layers]
        return jnp.stack(arrs, axis=0)

    wqT = stack("wq", True);  bq = stack("bq", False)
    wkT = stack("wk", True);  bk = stack("bk", False)
    wvT = stack("wv", True);  bv = stack("bv", False)
    woT = stack("wo", True);  bo = stack("bo", False)
    ln1g = stack("ln1g", False); ln1b = stack("ln1b", False)
    w1T = stack("w1", True);  b1 = stack("b1", False)
    w2T = stack("w2", True);  b2 = stack("b2", False)
    ln2g = stack("ln2g", False); ln2b = stack("ln2b", False)
    F = w1T.shape[-1]

    # --- batch tiling (up to 8 rows per grid step), pad B if needed ---
    b_tile = min(8, B)
    num_bt = pl.cdiv(B, b_tile)
    B_pad = num_bt * b_tile
    x = last_hidden_state
    if B_pad != B:
        x = jnp.concatenate([x, jnp.zeros((B_pad - B, L, D), x.dtype)], axis=0)
    x_flat = x.reshape(B_pad * L, D)        # lane-dense (rows, D) slab for K/V proj

    # q = self._Q(self.token) with token == [1.0]  ->  q_w[:, 0]
    q_vec = params["q_w"][:, 0].reshape(1, D)

    # per-head feature mask (computed once): hm[h, d] = 1 iff d // dh == h
    dh = D // num_heads
    head_mask = (jnp.arange(D)[None, :] // dh
                 == jnp.arange(num_heads)[:, None]).astype(jnp.float32)   # (H, D)

    def cspec(shape):            # grid-invariant small input
        nd = len(shape)
        return pl.BlockSpec(shape, lambda bi, li, _n=nd: (0,) * _n)

    def wspec(shape):            # stacked per-layer weight: select layer `li`
        nd = len(shape)
        return pl.BlockSpec((1,) + shape, lambda bi, li, _n=nd: (li,) + (0,) * _n)

    kernel = functools.partial(_senti_blocks_kernel,
                               num_heads=num_heads, b_tile=b_tile, seq_len=L)

    sent_vec, attn = pl.pallas_call(
        kernel,
        out_shape=(jax.ShapeDtypeStruct((B_pad, D), last_hidden_state.dtype),
                   jax.ShapeDtypeStruct((B_pad, L), jnp.float32)),
        grid=(num_bt, n_layers),
        in_specs=[
            cspec((1, D)),                                           # q
            pl.BlockSpec((b_tile * L, D), lambda bi, li: (bi, 0)),   # x (flattened)
            cspec((num_heads, D)),                                   # head mask
            wspec((D, D)), wspec((1, D)),                            # WqT, bq
            wspec((D, D)), wspec((1, D)),                            # WkT, bk
            wspec((D, D)), wspec((1, D)),                            # WvT, bv
            wspec((D, D)), wspec((1, D)),                            # WoT, bo
            wspec((1, D)), wspec((1, D)),                            # LN1 gamma, beta
            wspec((D, F)), wspec((1, F)),                            # W1T, b1
            wspec((F, D)), wspec((1, D)),                            # W2T, b2
            wspec((1, D)), wspec((1, D)),                            # LN2 gamma, beta
        ],
        out_specs=(pl.BlockSpec((b_tile, D), lambda bi, li: (bi, 0)),
                   pl.BlockSpec((b_tile, L), lambda bi, li: (bi, 0))),
        scratch_shapes=[pltpu.VMEM((b_tile, D), jnp.float32)],       # carried query
        compiler_params=pltpu.CompilerParams(
            dimension_semantics=("parallel", "arbitrary"),
            vmem_limit_bytes=48 * 1024 * 1024,
        ),
    )(q_vec, x_flat, head_mask,
      wqT, bq, wkT, bk, wvT, bv, woT, bo, ln1g, ln1b,
      w1T, b1, w2T, b2, ln2g, ln2b)

    sent_vec = sent_vec[:B]                   # (B, D)
    attn = attn[:B].reshape(B, 1, L)          # PyTorch attn-weight shape (B, 1, L)
    if return_attn_weight:
        return sent_vec, attn
    return sent_vec


def _reference_forward(last_hidden_state, params, num_heads):
    """Pure-JAX reference with identical semantics (for correctness check)."""
    B, L, D = last_hidden_state.shape
    dh = D // num_heads
    q = jnp.broadcast_to(params["q_w"][:, 0][None, :], (B, D)).astype(jnp.float32)
    x = last_hidden_state.astype(jnp.float32)
    attn_avg = None
    for p in params["layers"]:
        qh = q @ p["wq"].T + p["bq"]
        kh = x @ p["wk"].T + p["bk"]
        vh = x @ p["wv"].T + p["bv"]
        qh_h = qh.reshape(B, num_heads, dh)
        kh_h = kh.reshape(B, L, num_heads, dh)
        vh_h = vh.reshape(B, L, num_heads, dh)
        scores = jnp.einsum('bhd,blhd->bhl', qh_h, kh_h) / jnp.sqrt(jnp.float32(dh))
        probs = jax.nn.softmax(scores, axis=-1)
        ctx_h = jnp.einsum('bhl,blhd->bhd', probs, vh_h)
        ctx = ctx_h.reshape(B, D)
        attn_avg = jnp.mean(probs, axis=1)
        attn_out = ctx @ p["wo"].T + p["bo"]
        h1 = q + attn_out
        mu1 = jnp.mean(h1, -1, keepdims=True)
        v1 = jnp.mean((h1 - mu1) ** 2, -1, keepdims=True)
        h1n = (h1 - mu1) / jnp.sqrt(v1 + 1e-5) * p["ln1g"] + p["ln1b"]
        f = jnp.maximum(h1n @ p["w1"].T + p["b1"], 0.0) @ p["w2"].T + p["b2"]
        h2 = h1n + f
        mu2 = jnp.mean(h2, -1, keepdims=True)
        v2 = jnp.mean((h2 - mu2) ** 2, -1, keepdims=True)
        q = (h2 - mu2) / jnp.sqrt(v2 + 1e-5) * p["ln2g"] + p["ln2b"]
    return q, attn_avg.reshape(B, 1, L)


if __name__ == "__main__":
    # Small shapes consistent with the module: batch=2, seq=8, hidDim=32, 4 heads, 2 layers.
    B, L, D, H, F, LAYERS = 2, 8, 32, 4, 64, 2

    key = jax.random.PRNGKey(0)
    k_x, k_p = jax.random.split(key)
    last_hidden_state = jax.random.normal(k_x, (B, L, D), jnp.float32)
    params = init_params(k_p, LAYERS, D, F)

    sent_vec, attn_w = senti_classifier_forward(
        last_hidden_state, params, num_heads=H, return_attn_weight=True)
    jax.block_until_ready((sent_vec, attn_w))

    assert sent_vec.shape == (B, D)
    assert attn_w.shape == (B, 1, L)

    ref_vec, ref_attn = _reference_forward(last_hidden_state, params, H)
    assert jnp.allclose(sent_vec, ref_vec, rtol=1e-2, atol=1e-2)
    assert jnp.allclose(attn_w, ref_attn, rtol=1e-2, atol=1e-2)

    print("KERNEL_OK")
</pallas_src>

<mosaic_0001>
module attributes {stable_mosaic.version = 11 : i64} {
  func.func @_senti_blocks_kernel(%arg0: i32, %arg1: i32, %arg2: memref<1x32xf32, #tpu.memory_space<vmem>>, %arg3: memref<16x32xf32, #tpu.memory_space<vmem>>, %arg4: memref<4x32xf32, #tpu.memory_space<vmem>>, %arg5: memref<1x32x32xf32, #tpu.memory_space<vmem>>, %arg6: memref<1x1x32xf32, #tpu.memory_space<vmem>>, %arg7: memref<1x32x32xf32, #tpu.memory_space<vmem>>, %arg8: memref<1x1x32xf32, #tpu.memory_space<vmem>>, %arg9: memref<1x32x32xf32, #tpu.memory_space<vmem>>, %arg10: memref<1x1x32xf32, #tpu.memory_space<vmem>>, %arg11: memref<1x32x32xf32, #tpu.memory_space<vmem>>, %arg12: memref<1x1x32xf32, #tpu.memory_space<vmem>>, %arg13: memref<1x1x32xf32, #tpu.memory_space<vmem>>, %arg14: memref<1x1x32xf32, #tpu.memory_space<vmem>>, %arg15: memref<1x32x64xf32, #tpu.memory_space<vmem>>, %arg16: memref<1x1x64xf32, #tpu.memory_space<vmem>>, %arg17: memref<1x64x32xf32, #tpu.memory_space<vmem>>, %arg18: memref<1x1x32xf32, #tpu.memory_space<vmem>>, %arg19: memref<1x1x32xf32, #tpu.memory_space<vmem>>, %arg20: memref<1x1x32xf32, #tpu.memory_space<vmem>>, %arg21: memref<2x32xf32, #tpu.memory_space<vmem>>, %arg22: memref<2x8xf32, #tpu.memory_space<vmem>>, %arg23: memref<2x32xf32, #tpu.memory_space<vmem>>) attributes {dimension_semantics = [#tpu.dimension_semantics<parallel>, #tpu.dimension_semantics<arbitrary>], iteration_bounds = array<i64: 1, 2>, scalar_prefetch = 0 : i64, scratch_operands = 1 : i64, tpu.core_type = #tpu.core_type<tc>, window_params = [{pipeline_mode = #tpu.pipeline_mode<synchronous>, transform_indices = @transform_0, window_bounds = array<i64: 1, 32>}, {transform_indices = @transform_1, window_bounds = array<i64: 16, 32>}, {pipeline_mode = #tpu.pipeline_mode<synchronous>, transform_indices = @transform_2, window_bounds = array<i64: 4, 32>}, {transform_indices = @transform_3, window_bounds = array<i64: 1, 32, 32>}, {transform_indices = @transform_4, window_bounds = array<i64: 1, 1, 32>}, {transform_indices = @transform_5, window_bounds = array<i64: 1, 32, 32>}, {transform_indices = @transform_6, window_bounds = array<i64: 1, 1, 32>}, {transform_indices = @transform_7, window_bounds = array<i64: 1, 32, 32>}, {transform_indices = @transform_8, window_bounds = array<i64: 1, 1, 32>}, {transform_indices = @transform_9, window_bounds = array<i64: 1, 32, 32>}, {transform_indices = @transform_10, window_bounds = array<i64: 1, 1, 32>}, {transform_indices = @transform_11, window_bounds = array<i64: 1, 1, 32>}, {transform_indices = @transform_12, window_bounds = array<i64: 1, 1, 32>}, {transform_indices = @transform_13, window_bounds = array<i64: 1, 32, 64>}, {transform_indices = @transform_14, window_bounds = array<i64: 1, 1, 64>}, {transform_indices = @transform_15, window_bounds = array<i64: 1, 64, 32>}, {transform_indices = @transform_16, window_bounds = array<i64: 1, 1, 32>}, {transform_indices = @transform_17, window_bounds = array<i64: 1, 1, 32>}, {transform_indices = @transform_18, window_bounds = array<i64: 1, 1, 32>}, {transform_indices = @transform_19, window_bounds = array<i64: 2, 32>}, {transform_indices = @transform_20, window_bounds = array<i64: 2, 8>}]} {
    %cst = arith.constant 8.000000e+00 : f32
    %0 = math.sqrt %cst : f32
    %cst_0 = arith.constant 1.000000e+00 : f32
    %1 = arith.divf %cst_0, %0 : f32
    %c0_i32 = arith.constant 0 : i32
    %2 = arith.cmpi eq, %arg1, %c0_i32 : i32
    %3 = arith.extui %2 : i1 to i32
    %c0_i32_1 = arith.constant 0 : i32
    %4 = arith.cmpi ne, %3, %c0_i32_1 : i32
    scf.if %4 {
      %c0_82 = arith.constant 0 : index
      %c0_83 = arith.constant 0 : index
      %138 = vector.load %arg2[%c0_82, %c0_83] : memref<1x32xf32, #tpu.memory_space<vmem>>, vector<1x32xf32>
      %139 = vector.shape_cast %138 : vector<1x32xf32> to vector<1x32xf32>
      %140 = vector.broadcast %139 : vector<1x32xf32> to vector<2x32xf32>
      %c0_84 = arith.constant 0 : index
      %c0_85 = arith.constant 0 : index
      %141 = vector.load %arg23[%c0_84, %c0_85] : memref<2x32xf32, #tpu.memory_space<vmem>>, vector<2x32xf32>
      tpu.vector_store %arg23[%c0_84, %c0_85], %140 {strides = array<i32>} : memref<2x32xf32, #tpu.memory_space<vmem>>, vector<2x32xf32>,
    } else {
    }
    %c0 = arith.constant 0 : index
    %c0_2 = arith.constant 0 : index
    %5 = vector.load %arg23[%c0, %c0_2] : memref<2x32xf32, #tpu.memory_space<vmem>>, vector<2x32xf32>
    %c0_3 = arith.constant 0 : index
    %c0_4 = arith.constant 0 : index
    %6 = vector.load %arg3[%c0_3, %c0_4] : memref<16x32xf32, #tpu.memory_space<vmem>>, vector<16x32xf32>
    %c0_5 = arith.constant 0 : index
    %c0_6 = arith.constant 0 : index
    %c0_7 = arith.constant 0 : index
    %7 = vector.load %arg5[%c0_5, %c0_6, %c0_7] : memref<1x32x32xf32, #tpu.memory_space<vmem>>, vector<1x32x32xf32>
    %8 = vector.shape_cast %7 : vector<1x32x32xf32> to vector<32x32xf32>
    %cst_8 = arith.constant dense<0.000000e+00> : vector<2x32xf32>
    %9 = tpu.matmul %5, %8, %cst_8 {dimension_numbers = #tpu.dot_dimension_numbers<[1], [0], [0], [1], [0, 0, 1, 1], [], []>} : vector<2x32xf32>, vector<32x32xf32>, vector<2x32xf32> -> vector<2x32xf32>
    %c0_9 = arith.constant 0 : index
    %c0_10 = arith.constant 0 : index
    %c0_11 = arith.constant 0 : index
    %10 = vector.load %arg6[%c0_9, %c0_10, %c0_11] : memref<1x1x32xf32, #tpu.memory_space<vmem>>, vector<1x1x32xf32>
    %11 = vector.shape_cast %10 : vector<1x1x32xf32> to vector<1x32xf32>
    %12 = vector.broadcast %11 : vector<1x32xf32> to vector<2x32xf32>
    %13 = arith.addf %9, %12 : vector<2x32xf32>
    %c0_12 = arith.constant 0 : index
    %c0_13 = arith.constant 0 : index
    %c0_14 = arith.constant 0 : index
    %14 = vector.load %arg7[%c0_12, %c0_13, %c0_14] : memref<1x32x32xf32, #tpu.memory_space<vmem>>, vector<1x32x32xf32>
    %15 = vector.shape_cast %14 : vector<1x32x32xf32> to vector<32x32xf32>
    %cst_15 = arith.constant dense<0.000000e+00> : vector<16x32xf32>
    %16 = tpu.matmul %6, %15, %cst_15 {dimension_numbers = #tpu.dot_dimension_numbers<[1], [0], [0], [1], [0, 0, 1, 1], [], []>} : vector<16x32xf32>, vector<32x32xf32>, vector<16x32xf32> -> vector<16x32xf32>
    %c0_16 = arith.constant 0 : index
    %c0_17 = arith.constant 0 : index
    %c0_18 = arith.constant 0 : index
    %17 = vector.load %arg8[%c0_16, %c0_17, %c0_18] : memref<1x1x32xf32, #tpu.memory_space<vmem>>, vector<1x1x32xf32>
    %18 = vector.shape_cast %17 : vector<1x1x32xf32> to vector<1x32xf32>
    %19 = vector.broadcast %18 : vector<1x32xf32> to vector<16x32xf32>
    %20 = arith.addf %16, %19 : vector<16x32xf32>
    %c0_19 = arith.constant 0 : index
    %c0_20 = arith.constant 0 : index
    %c0_21 = arith.constant 0 : index
    %21 = vector.load %arg9[%c0_19, %c0_20, %c0_21] : memref<1x32x32xf32, #tpu.memory_space<vmem>>, vector<1x32x32xf32>
    %22 = vector.shape_cast %21 : vector<1x32x32xf32> to vector<32x32xf32>
    %cst_22 = arith.constant dense<0.000000e+00> : vector<16x32xf32>
    %23 = tpu.matmul %6, %22, %cst_22 {dimension_numbers = #tpu.dot_dimension_numbers<[1], [0], [0], [1], [0, 0, 1, 1], [], []>} : vector<16x32xf32>, vector<32x32xf32>, vector<16x32xf32> -> vector<16x32xf32>
    %c0_23 = arith.constant 0 : index
    %c0_24 = arith.constant 0 : index
    %c0_25 = arith.constant 0 : index
    %24 = vector.load %arg10[%c0_23, %c0_24, %c0_25] : memref<1x1x32xf32, #tpu.memory_space<vmem>>, vector<1x1x32xf32>
    %25 = vector.shape_cast %24 : vector<1x1x32xf32> to vector<1x32xf32>
    %26 = vector.broadcast %25 : vector<1x32xf32> to vector<16x32xf32>
    %27 = arith.addf %23, %26 : vector<16x32xf32>
    %28 = vector.shape_cast %20 : vector<16x32xf32> to vector<2x8x32xf32>
    %29 = vector.shape_cast %27 : vector<16x32xf32> to vector<2x8x32xf32>
    %c0_26 = arith.constant 0 : index
    %c0_27 = arith.constant 0 : index
    %30 = vector.load %arg4[%c0_26, %c0_27] : memref<4x32xf32, #tpu.memory_space<vmem>>, vector<4x32xf32>
    %31 = vector.shape_cast %13 : vector<2x32xf32> to vector<2x1x32xf32>
    %32 = vector.shape_cast %30 : vector<4x32xf32> to vector<1x4x32xf32>
    %33 = vector.broadcast %31 : vector<2x1x32xf32> to vector<2x4x32xf32>
    %34 = vector.broadcast %32 : vector<1x4x32xf32> to vector<2x4x32xf32>
    %35 = arith.mulf %33, %34 : vector<2x4x32xf32>
    "tpu.trace_start"() <{level = 10 : i32, message = "bhd,bld->bhl"}> : () -> ()
    %cst_28 = arith.constant dense<0.000000e+00> : vector<2x4x8xf32>
    %36 = tpu.matmul %35, %28, %cst_28 {dimension_numbers = #tpu.dot_dimension_numbers<[2], [2], [1], [1], [0, 0, 0, 1, 1, 1], [0], [0]>} : vector<2x4x32xf32>, vector<2x8x32xf32>, vector<2x4x8xf32> -> vector<2x4x8xf32>
    "tpu.trace_stop"() : () -> ()
    %37 = vector.broadcast %1 : f32 to vector<2x4x8xf32>
    %38 = arith.mulf %36, %37 : vector<2x4x8xf32>
    %cst_29 = arith.constant dense<0xFF800000> : vector<2x4xf32>
    %39 = vector.multi_reduction <maximumf>, %38, %cst_29 [2] : vector<2x4x8xf32> to vector<2x4xf32>
    %40 = vector.shape_cast %39 : vector<2x4xf32> to vector<2x4x1xf32>
    %41 = vector.broadcast %40 : vector<2x4x1xf32> to vector<2x4x8xf32>
    %42 = arith.subf %38, %41 : vector<2x4x8xf32>
    %43 = math.exp %42 : vector<2x4x8xf32>
    %cst_30 = arith.constant dense<0.000000e+00> : vector<2x4xf32>
    %44 = vector.multi_reduction <add>, %43, %cst_30 [2] : vector<2x4x8xf32> to vector<2x4xf32>
    %45 = vector.shape_cast %44 : vector<2x4xf32> to vector<2x4x1xf32>
    %46 = tpu.reciprocal %45 {approx = true} : vector<2x4x1xf32> -> vector<2x4x1xf32>
    %47 = vector.broadcast %46 : vector<2x4x1xf32> to vector<2x4x8xf32>
    %48 = arith.mulf %43, %47 : vector<2x4x8xf32>
    "tpu.trace_start"() <{level = 10 : i32, message = "bhl,bld->bhd"}> : () -> ()
    %cst_31 = arith.constant dense<0.000000e+00> : vector<2x4x32xf32>
    %49 = tpu.matmul %48, %29, %cst_31 {dimension_numbers = #tpu.dot_dimension_numbers<[2], [1], [1], [2], [0, 0, 0, 1, 1, 2], [0], [0]>} : vector<2x4x8xf32>, vector<2x8x32xf32>, vector<2x4x32xf32> -> vector<2x4x32xf32>
    "tpu.trace_stop"() : () -> ()
    %50 = vector.shape_cast %30 : vector<4x32xf32> to vector<1x4x32xf32>
    %51 = vector.broadcast %50 : vector<1x4x32xf32> to vector<2x4x32xf32>
    %52 = arith.mulf %49, %51 : vector<2x4x32xf32>
    %cst_32 = arith.constant dense<0.000000e+00> : vector<2x32xf32>
    %53 = vector.multi_reduction <add>, %52, %cst_32 [1] : vector<2x4x32xf32> to vector<2x32xf32>
    %cst_33 = arith.constant dense<0.000000e+00> : vector<2x8xf32>
    %54 = vector.multi_reduction <add>, %48, %cst_33 [1] : vector<2x4x8xf32> to vector<2x8xf32>
    %cst_34 = arith.constant 4.000000e+00 : f32
    %55 = vector.broadcast %cst_34 : f32 to vector<2x8xf32>
    %56 = arith.divf %54, %55 : vector<2x8xf32>
    %c0_35 = arith.constant 0 : index
    %c0_36 = arith.constant 0 : index
    %c0_37 = arith.constant 0 : index
    %57 = vector.load %arg11[%c0_35, %c0_36, %c0_37] : memref<1x32x32xf32, #tpu.memory_space<vmem>>, vector<1x32x32xf32>
    %58 = vector.shape_cast %57 : vector<1x32x32xf32> to vector<32x32xf32>
    %cst_38 = arith.constant dense<0.000000e+00> : vector<2x32xf32>
    %59 = tpu.matmul %53, %58, %cst_38 {dimension_numbers = #tpu.dot_dimension_numbers<[1], [0], [0], [1], [0, 0, 1, 1], [], []>} : vector<2x32xf32>, vector<32x32xf32>, vector<2x32xf32> -> vector<2x32xf32>
    %c0_39 = arith.constant 0 : index
    %c0_40 = arith.constant 0 : index
    %c0_41 = arith.constant 0 : index
    %60 = vector.load %arg12[%c0_39, %c0_40, %c0_41] : memref<1x1x32xf32, #tpu.memory_space<vmem>>, vector<1x1x32xf32>
    %61 = vector.shape_cast %60 : vector<1x1x32xf32> to vector<1x32xf32>
    %62 = vector.broadcast %61 : vector<1x32xf32> to vector<2x32xf32>
    %63 = arith.addf %59, %62 : vector<2x32xf32>
    %64 = arith.addf %5, %63 : vector<2x32xf32>
    %cst_42 = arith.constant dense<0.000000e+00> : vector<2xf32>
    %65 = vector.multi_reduction <add>, %64, %cst_42 [1] : vector<2x32xf32> to vector<2xf32>
    %66 = vector.shape_cast %65 : vector<2xf32> to vector<2x1xf32>
    %cst_43 = arith.constant 3.200000e+01 : f32
    %67 = vector.broadcast %cst_43 : f32 to vector<2x1xf32>
    %68 = arith.divf %66, %67 : vector<2x1xf32>
    %69 = vector.broadcast %68 : vector<2x1xf32> to vector<2x32xf32>
    %70 = arith.subf %64, %69 : vector<2x32xf32>
    %71 = arith.mulf %70, %70 : vector<2x32xf32>
    %cst_44 = arith.constant dense<0.000000e+00> : vector<2xf32>
    %72 = vector.multi_reduction <add>, %71, %cst_44 [1] : vector<2x32xf32> to vector<2xf32>
    %73 = vector.shape_cast %72 : vector<2xf32> to vector<2x1xf32>
    %cst_45 = arith.constant 3.200000e+01 : f32
    %74 = vector.broadcast %cst_45 : f32 to vector<2x1xf32>
    %75 = arith.divf %73, %74 : vector<2x1xf32>
    %76 = vector.broadcast %68 : vector<2x1xf32> to vector<2x32xf32>
    %77 = arith.subf %64, %76 : vector<2x32xf32>
    %cst_46 = arith.constant 9.99999974E-6 : f32
    %78 = vector.broadcast %cst_46 : f32 to vector<2x1xf32>
    %79 = arith.addf %75, %78 : vector<2x1xf32>
    %80 = math.rsqrt %79 : vector<2x1xf32>
    %81 = vector.broadcast %80 : vector<2x1xf32> to vector<2x32xf32>
    %82 = arith.mulf %77, %81 : vector<2x32xf32>
    %c0_47 = arith.constant 0 : index
    %c0_48 = arith.constant 0 : index
    %c0_49 = arith.constant 0 : index
    %83 = vector.load %arg13[%c0_47, %c0_48, %c0_49] : memref<1x1x32xf32, #tpu.memory_space<vmem>>, vector<1x1x32xf32>
    %84 = vector.shape_cast %83 : vector<1x1x32xf32> to vector<1x32xf32>
    %85 = vector.broadcast %84 : vector<1x32xf32> to vector<2x32xf32>
    %86 = arith.mulf %82, %85 : vector<2x32xf32>
    %c0_50 = arith.constant 0 : index
    %c0_51 = arith.constant 0 : index
    %c0_52 = arith.constant 0 : index
    %87 = vector.load %arg14[%c0_50, %c0_51, %c0_52] : memref<1x1x32xf32, #tpu.memory_space<vmem>>, vector<1x1x32xf32>
    %88 = vector.shape_cast %87 : vector<1x1x32xf32> to vector<1x32xf32>
    %89 = vector.broadcast %88 : vector<1x32xf32> to vector<2x32xf32>
    %90 = arith.addf %86, %89 : vector<2x32xf32>
    %c0_53 = arith.constant 0 : index
    %c0_54 = arith.constant 0 : index
    %c0_55 = arith.constant 0 : index
    %91 = vector.load %arg15[%c0_53, %c0_54, %c0_55] : memref<1x32x64xf32, #tpu.memory_space<vmem>>, vector<1x32x64xf32>
    %92 = vector.shape_cast %91 : vector<1x32x64xf32> to vector<32x64xf32>
    %cst_56 = arith.constant dense<0.000000e+00> : vector<2x64xf32>
    %93 = tpu.matmul %90, %92, %cst_56 {dimension_numbers = #tpu.dot_dimension_numbers<[1], [0], [0], [1], [0, 0, 1, 1], [], []>} : vector<2x32xf32>, vector<32x64xf32>, vector<2x64xf32> -> vector<2x64xf32>
    %c0_57 = arith.constant 0 : index
    %c0_58 = arith.constant 0 : index
    %c0_59 = arith.constant 0 : index
    %94 = vector.load %arg16[%c0_57, %c0_58, %c0_59] : memref<1x1x64xf32, #tpu.memory_space<vmem>>, vector<1x1x64xf32>
    %95 = vector.shape_cast %94 : vector<1x1x64xf32> to vector<1x64xf32>
    %96 = vector.broadcast %95 : vector<1x64xf32> to vector<2x64xf32>
    %97 = arith.addf %93, %96 : vector<2x64xf32>
    %cst_60 = arith.constant 0.000000e+00 : f32
    %98 = vector.broadcast %cst_60 : f32 to vector<2x64xf32>
    %99 = arith.maximumf %97, %98 : vector<2x64xf32>
    %c0_61 = arith.constant 0 : index
    %c0_62 = arith.constant 0 : index
    %c0_63 = arith.constant 0 : index
    %100 = vector.load %arg17[%c0_61, %c0_62, %c0_63] : memref<1x64x32xf32, #tpu.memory_space<vmem>>, vector<1x64x32xf32>
    %101 = vector.shape_cast %100 : vector<1x64x32xf32> to vector<64x32xf32>
    %cst_64 = arith.constant dense<0.000000e+00> : vector<2x32xf32>
    %102 = tpu.matmul %99, %101, %cst_64 {dimension_numbers = #tpu.dot_dimension_numbers<[1], [0], [0], [1], [0, 0, 1, 1], [], []>} : vector<2x64xf32>, vector<64x32xf32>, vector<2x32xf32> -> vector<2x32xf32>
    %c0_65 = arith.constant 0 : index
    %c0_66 = arith.constant 0 : index
    %c0_67 = arith.constant 0 : index
    %103 = vector.load %arg18[%c0_65, %c0_66, %c0_67] : memref<1x1x32xf32, #tpu.memory_space<vmem>>, vector<1x1x32xf32>
    %104 = vector.shape_cast %103 : vector<1x1x32xf32> to vector<1x32xf32>
    %105 = vector.broadcast %104 : vector<1x32xf32> to vector<2x32xf32>
    %106 = arith.addf %102, %105 : vector<2x32xf32>
    %107 = arith.addf %90, %106 : vector<2x32xf32>
    %cst_68 = arith.constant dense<0.000000e+00> : vector<2xf32>
    %108 = vector.multi_reduction <add>, %107, %cst_68 [1] : vector<2x32xf32> to vector<2xf32>
    %109 = vector.shape_cast %108 : vector<2xf32> to vector<2x1xf32>
    %cst_69 = arith.constant 3.200000e+01 : f32
    %110 = vector.broadcast %cst_69 : f32 to vector<2x1xf32>
    %111 = arith.divf %109, %110 : vector<2x1xf32>
    %112 = vector.broadcast %111 : vector<2x1xf32> to vector<2x32xf32>
    %113 = arith.subf %107, %112 : vector<2x32xf32>
    %114 = arith.mulf %113, %113 : vector<2x32xf32>
    %cst_70 = arith.constant dense<0.000000e+00> : vector<2xf32>
    %115 = vector.multi_reduction <add>, %114, %cst_70 [1] : vector<2x32xf32> to vector<2xf32>
    %116 = vector.shape_cast %115 : vector<2xf32> to vector<2x1xf32>
    %cst_71 = arith.constant 3.200000e+01 : f32
    %117 = vector.broadcast %cst_71 : f32 to vector<2x1xf32>
    %118 = arith.divf %116, %117 : vector<2x1xf32>
    %119 = vector.broadcast %111 : vector<2x1xf32> to vector<2x32xf32>
    %120 = arith.subf %107, %119 : vector<2x32xf32>
    %cst_72 = arith.constant 9.99999974E-6 : f32
    %121 = vector.broadcast %cst_72 : f32 to vector<2x1xf32>
    %122 = arith.addf %118, %121 : vector<2x1xf32>
    %123 = math.rsqrt %122 : vector<2x1xf32>
    %124 = vector.broadcast %123 : vector<2x1xf32> to vector<2x32xf32>
    %125 = arith.mulf %120, %124 : vector<2x32xf32>
    %c0_73 = arith.constant 0 : index
    %c0_74 = arith.constant 0 : index
    %c0_75 = arith.constant 0 : index
    %126 = vector.load %arg19[%c0_73, %c0_74, %c0_75] : memref<1x1x32xf32, #tpu.memory_space<vmem>>, vector<1x1x32xf32>
    %127 = vector.shape_cast %126 : vector<1x1x32xf32> to vector<1x32xf32>
    %128 = vector.broadcast %127 : vector<1x32xf32> to vector<2x32xf32>
    %129 = arith.mulf %125, %128 : vector<2x32xf32>
    %c0_76 = arith.constant 0 : index
    %c0_77 = arith.constant 0 : index
    %c0_78 = arith.constant 0 : index
    %130 = vector.load %arg20[%c0_76, %c0_77, %c0_78] : memref<1x1x32xf32, #tpu.memory_space<vmem>>, vector<1x1x32xf32>
    %131 = vector.shape_cast %130 : vector<1x1x32xf32> to vector<1x32xf32>
    %132 = vector.broadcast %131 : vector<1x32xf32> to vector<2x32xf32>
    %133 = arith.addf %129, %132 : vector<2x32xf32>
    %c0_79 = arith.constant 0 : index
    %c0_80 = arith.constant 0 : index
    %134 = vector.load %arg23[%c0_79, %c0_80] : memref<2x32xf32, #tpu.memory_space<vmem>>, vector<2x32xf32>
    tpu.vector_store %arg23[%c0_79, %c0_80], %133 {strides = array<i32>} : memref<2x32xf32, #tpu.memory_space<vmem>>, vector<2x32xf32>,
    %c1_i32 = arith.constant 1 : i32
    %135 = arith.cmpi eq, %arg1, %c1_i32 : i32
    %136 = arith.extui %135 : i1 to i32
    %c0_i32_81 = arith.constant 0 : i32
    %137 = arith.cmpi ne, %136, %c0_i32_81 : i32
    scf.if %137 {
      %c0_82 = arith.constant 0 : index
      %c0_83 = arith.constant 0 : index
      %138 = vector.load %arg21[%c0_82, %c0_83] : memref<2x32xf32, #tpu.memory_space<vmem>>, vector<2x32xf32>
      tpu.vector_store %arg21[%c0_82, %c0_83], %133 {strides = array<i32>} : memref<2x32xf32, #tpu.memory_space<vmem>>, vector<2x32xf32>,
      %c0_84 = arith.constant 0 : index
      %c0_85 = arith.constant 0 : index
      %139 = vector.load %arg22[%c0_84, %c0_85] : memref<2x8xf32, #tpu.memory_space<vmem>>, vector<2x8xf32>
      tpu.vector_store %arg22[%c0_84, %c0_85], %56 {strides = array<i32>} : memref<2x8xf32, #tpu.memory_space<vmem>>, vector<2x8xf32>,
    } else {
    }
    return
  }
  func.func @transform_0(%arg0: i32, %arg1: i32) -> (i32, i32) {
    %c0_i32 = arith.constant 0 : i32
    %c0_i32_0 = arith.constant 0 : i32
    %c0_i32_1 = arith.constant 0 : i32
    return %c0_i32, %c0_i32_0 : i32, i32
  }
  func.func @transform_1(%arg0: i32, %arg1: i32) -> (i32, i32) {
    %c0_i32 = arith.constant 0 : i32
    %c0_i32_0 = arith.constant 0 : i32
    return %arg0, %c0_i32 : i32, i32
  }
  func.func @transform_2(%arg0: i32, %arg1: i32) -> (i32, i32) {
    %c0_i32 = arith.constant 0 : i32
    %c0_i32_0 = arith.constant 0 : i32
    %c0_i32_1 = arith.constant 0 : i32
    return %c0_i32, %c0_i32_0 : i32, i32
  }
  func.func @transform_3(%arg0: i32, %arg1: i32) -> (i32, i32, i32) {
    %c0_i32 = arith.constant 0 : i32
    %c0_i32_0 = arith.constant 0 : i32
    %c0_i32_1 = arith.constant 0 : i32
    return %arg1, %c0_i32, %c0_i32_0 : i32, i32, i32
  }
  func.func @transform_4(%arg0: i32, %arg1: i32) -> (i32, i32, i32) {
    %c0_i32 = arith.constant 0 : i32
    %c0_i32_0 = arith.constant 0 : i32
    %c0_i32_1 = arith.constant 0 : i32
    return %arg1, %c0_i32, %c0_i32_0 : i32, i32, i32
  }
  func.func @transform_5(%arg0: i32, %arg1: i32) -> (i32, i32, i32) {
    %c0_i32 = arith.constant 0 : i32
    %c0_i32_0 = arith.constant 0 : i32
    %c0_i32_1 = arith.constant 0 : i32
    return %arg1, %c0_i32, %c0_i32_0 : i32, i32, i32
  }
  func.func @transform_6(%arg0: i32, %arg1: i32) -> (i32, i32, i32) {
    %c0_i32 = arith.constant 0 : i32
    %c0_i32_0 = arith.constant 0 : i32
    %c0_i32_1 = arith.constant 0 : i32
    return %arg1, %c0_i32, %c0_i32_0 : i32, i32, i32
  }
  func.func @transform_7(%arg0: i32, %arg1: i32) -> (i32, i32, i32) {
    %c0_i32 = arith.constant 0 : i32
    %c0_i32_0 = arith.constant 0 : i32
    %c0_i32_1 = arith.constant 0 : i32
    return %arg1, %c0_i32, %c0_i32_0 : i32, i32, i32
  }
  func.func @transform_8(%arg0: i32, %arg1: i32) -> (i32, i32, i32) {
    %c0_i32 = arith.constant 0 : i32
    %c0_i32_0 = arith.constant 0 : i32
    %c0_i32_1 = arith.constant 0 : i32
    return %arg1, %c0_i32, %c0_i32_0 : i32, i32, i32
  }
  func.func @transform_9(%arg0: i32, %arg1: i32) -> (i32, i32, i32) {
    %c0_i32 = arith.constant 0 : i32
    %c0_i32_0 = arith.constant 0 : i32
    %c0_i32_1 = arith.constant 0 : i32
    return %arg1, %c0_i32, %c0_i32_0 : i32, i32, i32
  }
  func.func @transform_10(%arg0: i32, %arg1: i32) -> (i32, i32, i32) {
    %c0_i32 = arith.constant 0 : i32
    %c0_i32_0 = arith.constant 0 : i32
    %c0_i32_1 = arith.constant 0 : i32
    return %arg1, %c0_i32, %c0_i32_0 : i32, i32, i32
  }
  func.func @transform_11(%arg0: i32, %arg1: i32) -> (i32, i32, i32) {
    %c0_i32 = arith.constant 0 : i32
    %c0_i32_0 = arith.constant 0 : i32
    %c0_i32_1 = arith.constant 0 : i32
    return %arg1, %c0_i32, %c0_i32_0 : i32, i32, i32
  }
  func.func @transform_12(%arg0: i32, %arg1: i32) -> (i32, i32, i32) {
    %c0_i32 = arith.constant 0 : i32
    %c0_i32_0 = arith.constant 0 : i32
    %c0_i32_1 = arith.constant 0 : i32
    return %arg1, %c0_i32, %c0_i32_0 : i32, i32, i32
  }
  func.func @transform_13(%arg0: i32, %arg1: i32) -> (i32, i32, i32) {
    %c0_i32 = arith.constant 0 : i32
    %c0_i32_0 = arith.constant 0 : i32
    %c0_i32_1 = arith.constant 0 : i32
    return %arg1, %c0_i32, %c0_i32_0 : i32, i32, i32
  }
  func.func @transform_14(%arg0: i32, %arg1: i32) -> (i32, i32, i32) {
    %c0_i32 = arith.constant 0 : i32
    %c0_i32_0 = arith.constant 0 : i32
    %c0_i32_1 = arith.constant 0 : i32
    return %arg1, %c0_i32, %c0_i32_0 : i32, i32, i32
  }
  func.func @transform_15(%arg0: i32, %arg1: i32) -> (i32, i32, i32) {
    %c0_i32 = arith.constant 0 : i32
    %c0_i32_0 = arith.constant 0 : i32
    %c0_i32_1 = arith.constant 0 : i32
    return %arg1, %c0_i32, %c0_i32_0 : i32, i32, i32
  }
  func.func @transform_16(%arg0: i32, %arg1: i32) -> (i32, i32, i32) {
    %c0_i32 = arith.constant 0 : i32
    %c0_i32_0 = arith.constant 0 : i32
    %c0_i32_1 = arith.constant 0 : i32
    return %arg1, %c0_i32, %c0_i32_0 : i32, i32, i32
  }
  func.func @transform_17(%arg0: i32, %arg1: i32) -> (i32, i32, i32) {
    %c0_i32 = arith.constant 0 : i32
    %c0_i32_0 = arith.constant 0 : i32
    %c0_i32_1 = arith.constant 0 : i32
    return %arg1, %c0_i32, %c0_i32_0 : i32, i32, i32
  }
  func.func @transform_18(%arg0: i32, %arg1: i32) -> (i32, i32, i32) {
    %c0_i32 = arith.constant 0 : i32
    %c0_i32_0 = arith.constant 0 : i32
    %c0_i32_1 = arith.constant 0 : i32
    return %arg1, %c0_i32, %c0_i32_0 : i32, i32, i32
  }
  func.func @transform_19(%arg0: i32, %arg1: i32) -> (i32, i32) {
    %c0_i32 = arith.constant 0 : i32
    %c0_i32_0 = arith.constant 0 : i32
    return %arg0, %c0_i32 : i32, i32
  }
  func.func @transform_20(%arg0: i32, %arg1: i32) -> (i32, i32) {
    %c0_i32 = arith.constant 0 : i32
    %c0_i32_0 = arith.constant 0 : i32
    return %arg0, %c0_i32 : i32, i32
  }
}

</mosaic_0001>

<bundles_post_ra>
// kernel: senti_classifier_forward.1
= control target key start
LH: loop header
LB: loop body
LE: loop exit
PB: predicated region body
PF: predicated region fallthrough
CT: control target
= control target key end

     0   :  { %s2966_s0 = inlined_call_operand.vmem [shape: f32[1,32], index: 0, kind: input, shape index: {}]   ;;  %s2967_s1 = inlined_call_operand.vmem [shape: f32[16,32], index: 1, kind: input, shape index: {}]   ;;  %s2968_s2 = inlined_call_operand.vmem [shape: f32[4,32], index: 2, kind: input, shape index: {}]   ;;  %s2969_s3 = inlined_call_operand.vmem [shape: f32[2,32,32], index: 3, kind: input, shape index: {}]   ;;  %s2970_s4 = inlined_call_operand.vmem [shape: f32[2,1,32], index: 4, kind: input, shape index: {}]   ;;  %s2971_s5 = inlined_call_operand.vmem [shape: f32[2,32,32], index: 5, kind: input, shape index: {}]   ;;  %s2972_s6 = inlined_call_operand.vmem [shape: f32[2,1,32], index: 6, kind: input, shape index: {}]   ;;  %s2973_s7 = inlined_call_operand.vmem [shape: f32[2,32,32], index: 7, kind: input, shape index: {}]   ;;  %s2974_s8 = inlined_call_operand.vmem [shape: f32[2,1,32], index: 8, kind: input, shape index: {}]   ;;  %s2975_s9 = inlined_call_operand.vmem [shape: f32[2,32,32], index: 9, kind: input, shape index: {}]   ;;  %s2976_s10 = inlined_call_operand.vmem [shape: f32[2,1,32], index: 10, kind: input, shape index: {}]   ;;  %s2977_s11 = inlined_call_operand.vmem [shape: f32[2,1,32], index: 11, kind: input, shape index: {}]   ;;  %s2978_s12 = inlined_call_operand.vmem [shape: f32[2,1,32], index: 12, kind: input, shape index: {}]   ;;  %s2979_s13 = inlined_call_operand.vmem [shape: f32[2,32,64], index: 13, kind: input, shape index: {}]   ;;  %s2980_s14 = inlined_call_operand.vmem [shape: f32[2,1,64], index: 14, kind: input, shape index: {}]   ;;  %s2981_s15 = inlined_call_operand.vmem [shape: f32[2,64,32], index: 15, kind: input, shape index: {}]   ;;  %s2982_s16 = inlined_call_operand.vmem [shape: f32[2,1,32], index: 16, kind: input, shape index: {}]   ;;  %s2983_s17 = inlined_call_operand.vmem [shape: f32[2,1,32], index: 17, kind: input, shape index: {}]   ;;  %s2984_s18 = inlined_call_operand.vmem [shape: f32[2,1,32], index: 18, kind: input, shape index: {}]   ;;  %s2985_s19 = inlined_call_operand.hbm [shape: f32[2,32], index: 19, kind: output, shape index: {0}]   ;;  %s2986_s20 = inlined_call_operand.hbm [shape: f32[2,8], index: 20, kind: output, shape index: {1}]  }
   0x1   :  { %2994 = sst [smem:[#allocation14_spill]] %s2966_s0 }
   0x2   :  { %2995 = sst [smem:[#allocation15_spill]] %s2967_s1 }
   0x3   :  { %2996 = sst [smem:[#allocation16_spill]] %s2968_s2 }
   0x4   :  { %2997 = sst [smem:[#allocation17_spill]] %s2969_s3 }
   0x5   :  { %2998 = sst [smem:[#allocation18_spill]] %s2970_s4 }
   0x6   :  { %2999 = sst [smem:[#allocation19_spill]] %s2971_s5 }
   0x7   :  { %3000 = sst [smem:[#allocation20_spill]] %s2973_s7 }
   0x8   :  { %3001 = sst [smem:[#allocation21_spill]] %s2975_s9 }
   0x9   :  { %3002 = sst [smem:[#allocation22_spill]] %s2979_s13 }
   0xa   :  { %3003 = sst [smem:[#allocation23_spill]] %s2984_s18 }
   0xb   :  { %3004 = sst [smem:[#allocation24_spill]] %s2985_s19 }
   0xc   :  { %3005 = sst [smem:[#allocation25_spill]] %s2986_s20 }
   0xd   :  { %26 = vsyncpa [#allocation4], 0 }
   0xe   :  { %27 = vsyncpa [#allocation6], 0  ;;  %s2646_s1 = smov 0   ;;  %s2648_s22 = smov 0  }
   0xf   :  { %s2650_s23 = smov 0  }
  0x10 LB: > { %3006 = sst [smem:[#allocation9_spill]] %s2525_s1  ;;  %s42_s2 = sadd.s32 1, %s2529_s22  ;;  %s2533_s23 = sphi %s2650_s23, %s33_s23   ;;  %s2529_s22 = sphi %s2648_s22, %s3041_s22   ;;  %s2525_s1 = sphi %s2646_s1, %s3040_s1  }
  0x11   : > { %3007 = sst [smem:[#allocation10_spill]] %s2529_s22  ;;  %p43_p0 = scmp.ge.s32.totalorder %s42_s2, 2 }
  0x12   : > { %3008 = sst [smem:[#allocation11_spill]] %s2533_s23  ;;  %p2161_p1 = scmp.ge.s32.totalorder %s2533_s23, 1 }
  0x13   : > { %p720_p2 = scmp.lt.s32.totalorder %s2533_s23, 3  ;;  %s3043_s2 = smov (%p43_p0, %s42_s2), 0 }
  0x14   : > { %3009 = sst [smem:[#allocation12_spill]] %s3043_s2 }
  0x15   : > { %p721_p3 = pnand %p2161_p1, %p720_p2 }
  0x17   : > { %724 = sbr.rel (%p721_p3) target bundleno = 2386 (0x952), region = 96 }
  0x1e   : > { %p839_p4 = scmp.lt.s32.totalorder %s2525_s1, 1  ;;  %s3011_s0 = sld [smem:[#allocation17_spill]] }
  0x1f   : > { %s3012_s5 = sld [smem:[#allocation19_spill]]  ;;  %s3013_s7 = sld [smem:[#allocation20_spill]] }
  0x20   : > { %s2669_s25 = scalar_select %p839_p4, %s2525_s1, 1 }
  0x21   : > { %s3015_s9 = sld [smem:[#allocation21_spill]]  ;;  %s3016_s13 = sld [smem:[#allocation22_spill]] }
  0x22   : > { %s2207_s3 = sshll.u32 %s2669_s25, 5  ;;  %s892_s18 = scalar_lea.vmem %s2982_s16, %s2669_s25 }
  0x23   : > { %s3017_s23 = sld [smem:[#allocation23_spill]]  ;;  %s3018_s30 = sld [smem:[#allocation9_spill]] }
  0x24   : > { %s843_s21 = scalar_lea.vmem %s3011_s0, %s2207_s3 }
  0x25   : > { %s2682_s22 = scalar_lea.vmem %s3012_s5, %s2207_s3  ;;  %s2691_s26 = scalar_lea.vmem %s3013_s7, %s2207_s3 }
  0x26   : > { %3014 = sst [smem:[#allocation13_spill]] %s2691_s26  ;;  %s895_s26 = scalar_lea.vmem %s2983_s17, %s2669_s25 }
  0x27   : > { %s2700_s4 = scalar_lea.vmem %s3015_s9, %s2207_s3  ;;  %s2717_s28 = scalar_lea.vmem %s3016_s13, %s2207_s3 }
  0x28   : > { %s2212_s9 = sshll.u32 %s2669_s25, 6 }
  0x29   : > { %s2727_s5 = scalar_lea.vmem %s2981_s15, %s2212_s9  ;;  %s898_s13 = scalar_lea.vmem %s3017_s23, %s2669_s25 }
  0x2a   : > { %p2174_p5 = scmp.ne.s32.totalorder %s3018_s30, 0 }
  0x2b   : > { %s3019_s24 = sld [smem:[#allocation14_spill]] (!%p2174_p5)  ;;  %vm910_vm0 = vcmask (!%p2174_p5), 254976  }
  0x2c   : > { %902 = sbr.rel (%p2174_p5) target bundleno = 51 (0x33), region = 100 }
  0x31   : > { %v2175_v0 = vld [vmem:[%s3019_s24] ss:$0 sm:$0xff] (!%p2174_p5) }
  0x32   : > { %911 = vst.msk [vmem:[#allocation2] sm:$0x3] (!%p2174_p5), %vm910_vm0, %v2175_v0 }
  0x33 PF: > { %v915_v1 = vld [vmem:[%s843_s21] sm:$0xff]  ;;  %v916_v2 = vld [vmem:[%s843_s21 + $0x8] sm:$0xff]  ;;  %v917_v3 = vld [vmem:[%s843_s21 + $0x10] sm:$0xff]  ;;  %v2535_v4 = vmov 0.0|0.0   ;;  %vm2536_vm1 = vmmov 0   ;;  %v2537_v7 = vmov 0.0   ;;  %v1183_v20 = vlaneseq  ;;  %s3024_s30 = scalar_lea.vmem %s2972_s6, %s2669_s25  ;;  %s3027_s2 = scalar_lea.vmem %s2974_s8, %s2669_s25 }
  0x34   : > { %2351 = vmatprep.subr.bf16.mxu1 %v2535_v4  ;;  %v2352_v5 = vpack.c.bf16 %v916_v2, %v915_v1  ;;  %v918_v6 = vld [vmem:[%s843_s21 + $0x18] sm:$0xff]  ;;  %2265 = vmatprep.mubr.msk.f32.mxu1 %vm2536_vm1, %v2537_v7  ;;  %v1000_v8 = vld [vmem:[%s2682_s22] sm:$0xff]  ;;  %v1001_v9 = vld [vmem:[%s2682_s22 + $0x8] sm:$0xff]  ;;  %vm926_vm2 = vcmask 261120   ;;  %s3020_s23 = sld [smem:[#allocation15_spill]]  ;;  %s3022_s20 = sld [smem:[#allocation18_spill]] }
  0x35   : > { %v2355_v10 = vpack.c.bf16 %v918_v6, %v917_v3  ;;  %v2357_v12 = vpack.c.bf16 %v1001_v9, %v1000_v8  ;;  %v1002_v13 = vld [vmem:[%s2682_s22 + $0x10] sm:$0xff]  ;;  %v1003_v14 = vld [vmem:[%s2682_s22 + $0x18] sm:$0xff]  ;;  %v2538_v18 = vmov 1966171168   ;;  %v1184_v22 = vshrl.u32 %v1183_v20, 7  ;;  %s3025_s0 = sld [smem:[#allocation13_spill]]  ;;  %s3028_s19 = scalar_lea.vmem %s2976_s10, %s2669_s25 }
  0x36   : > { %2353 = vmatpush3.bf16.msra.mxu1 %v2352_v5  ;;  %v2361_v16 = vpack.c.bf16 %v1003_v14, %v1002_v13  ;;  %v1181_v19 = vunpack.c.l.s4 %v2538_v18  ;;  %v2178_v32 = vld [vmem:[%s3024_s30] ss:$0 sm:$0xff]  ;;  %s3026_s9 = sld [smem:[#allocation16_spill]]  ;;  %vm1368_vm3 = vcmask 60416   ;;  %vm1391_vm4 = vcmask 64512   ;;  %s3030_s30 = scalar_lea.vmem %s2978_s12, %s2669_s25 }
  0x37   : > { %2354 = vmatprep.subr.bf16.mxu1 %v2535_v4  ;;  %v1204_v31 = vsub.s32 0, %v1184_v22  ;;  %v2181_v5 = vld [vmem:[%s3027_s2] ss:$0 sm:$0xff]  ;;  %vm1540_vm5 = vcmask 257024   ;;  %vm1585_vm6 = vcmask 1041409   ;;  %vm1660_vm7 = vcmask 254976   ;;  %s3031_s7 = scalar_lea.vmem %s2980_s14, %s2669_s25 }
  0x38   : > { %v1182_v21 = vunpack.c.0.s8 %v1181_v19  ;;  %vm1791_vm8 = vcmask 523264   ;;  %s3033_s22 = sld [smem:[#allocation9_spill]] }
  0x39   : > { %v2757_v15 = vld [vmem:[#allocation2] sm:$0x3] }
  0x3a   : > { %s3021_s29 = smov %s3020_s23  ;;  %v913_v11 = vld [vmem:[%s3020_s23] sm:$0xff]  ;;  %2356 = vmatpush3.bf16.msra.mxu1 %v2355_v10  ;;  %s3023_s1 = scalar_lea.vmem %s3022_s20, %s2669_s25  ;;  %v1185_v24 = vsub.s32 %v1182_v21, %v1184_v22 }
  0x3b   : > { %2287 = vmatprep.mubr.msk.f32.mxu0 %vm926_vm2, %v913_v11  ;;  %2358 = vmatprep.subr.bf16.mxu1 %v2357_v12  ;;  %v914_v17 = vld [vmem:[%s3021_s29 + $0x8] sm:$0xff]  ;;  %v2176_v23 = vld [vmem:[%s3023_s1] ss:$0 sm:$0xff]  ;;  %v1094_v45 = vld [vmem:[%s3025_s0 + $0x10] sm:$0xff]  ;;  %s3029_s1 = scalar_lea.vmem %s2977_s11, %s2669_s25 }
  0x3c   : > { %v2782_v37 = vld [vmem:[%s3026_s9] sm:$0xf]  ;;  %v1093_v44 = vld [vmem:[%s3025_s0 + $0x8] sm:$0xff]  ;;  %v1095_v47 = vld [vmem:[%s3025_s0 + $0x18] sm:$0xff] }
  0x3d   : > { %2266 = vmatmul.mubr.msk.f32.vlgmr.msra.gmra.mrb[0].mxu1 %vm926_vm2, %v2757_v15  ;;  %v1092_v43 = vld [vmem:[%s3025_s0] sm:$0xff]  ;;  %v2369_v48 = vpack.c.bf16 %v1095_v47, %v1094_v45 }
  0x3e   : > { %2360 = vmatpush3.bf16.msra.mxu1 %v2357_v12  ;;  %2276 = vmatprep.mubr.msk.f32.mxu1 %vm926_vm2, %v913_v11  ;;  %v2365_v46 = vpack.c.bf16 %v1093_v44, %v1092_v43  ;;  %p2200_p6 = scmp.ne.s32.totalorder %s3033_s22, 1 }
  0x3f   : > { %2362 = vmatprep.subr.bf16.mxu1 %v2361_v16  ;;  %vm1905_vm9 = vcmask (!%p2200_p6), 58368  }
  0x40   : > { %2366 = vmatprep.subr.bf16.mxu0 %v2365_v46 }
  0x41   : > { %2368 = vmatpush3.bf16.msra.mxu0 %v2365_v46 }
  0x42   : > { %2364 = vmatpush3.bf16.msra.mxu1 %v2361_v16  ;;  %2370 = vmatprep.subr.bf16.mxu0 %v2369_v48 }
  0x43   : > { %2290 = vmatprep.subr.mxu1 %v2537_v7 }
  0x45   : > { %2277 = vmatmul.mubr.msk.f32.vlgmr.msra.gmra.mrb[2].mxu1 %vm926_vm2, %v914_v17  ;;  %2372 = vmatpush3.bf16.msra.mxu0 %v2369_v48 }
  0x46   : > { %2292 = vmatprep.mubr.msk.f32.mxu1 %vm2536_vm1, %v2537_v7  ;;  %2300 = vmatprep.subr.mxu0 %v2537_v7 }
  0x48   : > { %2288 = vmatmul.mubr.msk.f32.vlgmr.msra.gmra.mrb[0].mxu0 %vm926_vm2, %v914_v17 }
  0x49   : > { %2302 = vmatprep.mubr.msk.f32.mxu0 %vm2536_vm1, %v2537_v7 }
 0x110   : > { %v996_v25 = vpop.f32.mrb[0].mxu1 }
 0x111   : > { %v997_v26 = vadd.f32 %v2176_v23, %v996_v25  ;;  %v2267_v27 = vpop.f32.mrb[1].mxu1 }
 0x113   : > { %v1186_v28 = vrot.slane %v997_v26, %v1185_v24 }
 0x115   : > { %v1187_v29 = vcombine.high %v1186_v28, %v1186_v28  ;;  %v1194_v30 = vrot.slane %v1186_v28, %v1185_v24 }
 0x117   : > { %v1201_v34 = vrot.slane %v1187_v29, %v1185_v24  ;;  %v1205_v35 = vrot.slane %v1194_v30, %v1204_v31 }
 0x118   : > { %v2278_v33 = vpop.f32.mrb[2].mxu1 }
 0x119   : > { %v1083_v36 = vpop.f32.mrb[3].mxu1  ;;  %v1209_v39 = vrot.slane %v1201_v34, %v1204_v31  ;;  %v1212_v40 = vmul.f32 %v1205_v35, %v2782_v37  ;;  %v1089_v41 = vadd.f32 %v2278_v33, %v2178_v32  ;;  %v1572_v33 = vld [vmem:[%s2700_s4] sm:$0xff]  ;;  %v1573_v34 = vld [vmem:[%s2700_s4 + $0x8] sm:$0xff] }
 0x11a   : > { %v1084_v38 = vadd.f32 %v2178_v32, %v1083_v36  ;;  %v2374_v35 = vpack.c.bf16 %v1573_v34, %v1572_v33  ;;  %v1574_v36 = vld [vmem:[%s2700_s4 + $0x10] sm:$0xff]  ;;  %v1783_v34 = vld [vmem:[%s2727_s5 + $0x38] sm:$0xff] }
 0x11b   : > { %v1213_v42 = vmul.f32 %v1209_v39, %v2782_v37  ;;  %v2289_v3 = vpop.f32.mrb[0].mxu0  ;;  %v1782_v33 = vld [vmem:[%s2727_s5 + $0x30] sm:$0xff] }
 0x11c   : > { %2291 = vmatpush3.xpose.msk.msra.mxu1 %vm926_vm2, %v1084_v38  ;;  %v1169_v6 = vpop.f32.mrb[1].mxu0  ;;  %v1175_v9 = vadd.f32 %v2289_v3, %v2181_v5  ;;  %v1575_v38 = vld [vmem:[%s2700_s4 + $0x18] sm:$0xff] }
 0x11d   : > { %2295 = vmatprep.subr.mxu1 %v2537_v7  ;;  %v1170_v8 = vadd.f32 %v2181_v5, %v1169_v6  ;;  %v2377_v39 = vpack.c.bf16 %v1575_v38, %v1574_v36  ;;  %v2194_v36 = vld [vmem:[%s3031_s7] ss:$0 sm:$0xff] }
 0x11f   : > { %2293 = vmatmul.mubr.msk.f32.vlgmr.msra.gmra.mrb[4].mxu1 %vm926_vm2, %v1212_v40  ;;  %2301 = vmatpush3.msra.mxu0 %v1170_v8  ;;  %v1691_v8 = vld [vmem:[%s2717_s28] sm:$0xff] }
 0x120   : > { %2296 = vmatpush3.xpose.msk.msra.mxu1 %vm926_vm2, %v1089_v41  ;;  %2297 = vmatprep.mubr.msk.f32.mxu1 %vm2536_vm1, %v2537_v7 }
 0x121   : > { %2305 = vmatprep.subr.mxu1 %v2537_v7  ;;  %2373 = vmatprep.subr.bf16.mxu0 %v2535_v4 }
 0x123   : > { %2298 = vmatmul.mubr.msk.f32.vlgmr.msra.gmra.mrb[6].mxu1 %vm926_vm2, %v1213_v42 }
 0x124   : > { %2307 = vmatprep.mubr.msk.f32.mxu1 %vm2536_vm1, %v2537_v7  ;;  %2306 = vmatpush3.msra.mxu1 %v1175_v9  ;;  %v1692_v9 = vld [vmem:[%s2717_s28 + $0x8] sm:$0xff] }
 0x125   : > { %2379 = vmatprep.subr.bf16.mxu1 %v2535_v4 }
 0x1f2   : > { %v1286_v49 = vpop.f32.mrb[4].mxu1 }
 0x1f3   : > { %v1366_v50 = vmul.f32 0.35355338, %v1286_v49  ;;  %v2294_v51 = vpop.f32.mrb[5].mxu1 }
 0x1f5   : > { %v1369_v52 = vsel %vm1368_vm3, %v1366_v50, -inf }
 0x1f6   : > { %1370 = vmax.xlane.f32.xlu0 %v1369_v52  ;;  %v1362_v53 = vpop.f32.mrb[6].mxu1 }
 0x1f7   : > { %v1367_v54 = vmul.f32 0.35355338, %v1362_v53  ;;  %v2299_v55 = vpop.f32.mrb[7].mxu1 }
 0x1f9   : > { %v1372_v56 = vsel %vm1368_vm3, %v1367_v54, -inf }
 0x1fa   : > { %1373 = vmax.xlane.f32.xlu0 %v1372_v56 }
 0x283   : > { %v1371_v57 = vpop.xlane.xlu0 %1370 }
 0x284   : > { %v1375_v58 = vsub.f32 %v1366_v50, %v1371_v57 }
 0x286   : > { %v1377_v59 = vmul.f32 1.442695, %v1375_v58 }
 0x287   : > { %v1374_v60 = vpop.xlane.xlu0 %1373 }
 0x288   : > { %2439 = vpow2.f32 %v1377_v59  ;;  %v1376_v61 = vsub.f32 %v1367_v54, %v1374_v60 }
 0x28a   : > { %v1379_v62 = vmul.f32 1.442695, %v1376_v61 }
 0x28c   : > { %2441 = vpow2.f32 %v1379_v62 }
 0x292   : > { %v2440_v63 = vpop.eup %2439 }
 0x293   : > { %v1381_v0 = vsel %vm1368_vm3, %v2440_v63, 0.0 }
 0x294   : > { %1382 = vadd.xlane.f32.xlu1 %v1381_v0 }
 0x296   : > { %v2442_v1 = vpop.eup %2441 }
 0x297   : > { %v1384_v2 = vsel %vm1368_vm3, %v2442_v1, 0.0 }
 0x298   : > { %1385 = vadd.xlane.f32.xlu1 %v1384_v2 }
 0x321   : > { %v1383_v10 = vpop.xlane.xlu1 %1382 }
 0x322   : > { %2443 = vrcp.f32 %v1383_v10  ;;  %v2380_v10 = vpack.c.bf16 %v1692_v9, %v1691_v8 }
 0x325   : > { %v1386_v11 = vpop.xlane.xlu1 %1385 }
 0x326   : > { %2445 = vrcp.f32 %v1386_v11  ;;  %v1694_v11 = vld [vmem:[%s2717_s28 + $0x18] sm:$0xff] }
 0x32c   : > { %v2444_v12 = vpop.eup %2443 }
 0x32d   : > { %v1389_v13 = vmul.f32 %v2444_v12, %v2440_v63 }
 0x32f   : > { %v1555_v14 = vsel %vm1368_vm3, %v1389_v13, 0.0  ;;  %2303 = vmatmul.mubr.msk.f32.vlgmr.msra.gmra.mrb[2].mxu0 %vm1391_vm4, %v1389_v13  ;;  %v1776_v13 = vld [vmem:[%s2727_s5] sm:$0xff] }
 0x330   : > { %v2446_v16 = vpop.eup %2445  ;;  %v1556_v17 = vrot.slane %v1555_v14, 4  ;;  %2318 = vmatprep.mubr.msk.f32.mxu0 %vm2536_vm1, %v2537_v7  ;;  %2375 = vmatpush3.bf16.msra.mxu0 %v2374_v35  ;;  %v2395_v35 = vpack.c.bf16 %v1783_v34, %v1782_v33 }
 0x331   : > { %v1390_v18 = vmul.f32 %v2446_v16, %v2442_v1  ;;  %2376 = vmatprep.subr.bf16.mxu0 %v2535_v4  ;;  %v1778_v16 = vld [vmem:[%s2727_s5 + $0x10] sm:$0xff] }
 0x332   : > { %v1557_v19 = vadd.f32 %v1556_v17, %v1555_v14  ;;  %v1777_v14 = vld [vmem:[%s2727_s5 + $0x8] sm:$0xff] }
 0x333   : > { %v1562_v20 = vsel %vm1368_vm3, %v1390_v18, 0.0  ;;  %2308 = vmatmul.mubr.msk.f32.vlgmr.msra.gmra.mrb[8].mxu1 %vm1391_vm4, %v1390_v18  ;;  %v2386_v17 = vpack.c.bf16 %v1777_v14, %v1776_v13  ;;  %v1779_v18 = vld [vmem:[%s2727_s5 + $0x18] sm:$0xff] }
 0x334   : > { %v1558_v21 = vrot.slane %v1557_v19, 2  ;;  %v1563_v22 = vrot.slane %v1562_v20, 4  ;;  %2329 = vmatprep.mubr.msk.f32.mxu1 %vm2536_vm1, %v2537_v7  ;;  %2378 = vmatpush3.bf16.msra.mxu0 %v2377_v39 }
 0x335   : > { %2385 = vmatprep.subr.bf16.mxu0 %v2535_v4  ;;  %2381 = vmatpush3.bf16.msra.mxu1 %v2380_v10 }
 0x336   : > { %v1559_v23 = vadd.f32 %v1558_v21, %v1557_v19  ;;  %v1564_v24 = vadd.f32 %v1563_v22, %v1562_v20  ;;  %2382 = vmatprep.subr.bf16.mxu1 %v2535_v4  ;;  %v2389_v19 = vpack.c.bf16 %v1779_v18, %v1778_v16  ;;  %v1780_v20 = vld [vmem:[%s2727_s5 + $0x20] sm:$0xff]  ;;  %v1781_v21 = vld [vmem:[%s2727_s5 + $0x28] sm:$0xff] }
 0x337   : > { %v2392_v22 = vpack.c.bf16 %v1781_v21, %v1780_v20 }
 0x338   : > { %v1560_v25 = vrot.slane %v1559_v23, 1  ;;  %v1565_v26 = vrot.slane %v1564_v24, 2 }
 0x33a   : > { %v1561_v27 = vadd.f32 %v1560_v25, %v1559_v23  ;;  %v1566_v28 = vadd.f32 %v1565_v26, %v1564_v24 }
 0x33c   : > { %v2821_v29 = vmul.f32 0.25, %v1561_v27  ;;  %v1567_v30 = vrot.slane %v1566_v28, 1  ;;  %v2192_v27 = vld [vmem:[%s3029_s1] ss:$0 sm:$0xff] }
 0x33e   : > { %v1568_v31 = vadd.f32 %v1567_v30, %v1566_v28  ;;  %v2193_v30 = vld [vmem:[%s3030_s30] ss:$0 sm:$0xff] }
 0x340   : > { %v2823_v32 = vmul.f32 0.25, %v1568_v31 }
 0x402   : > { %v1461_v40 = vpop.f32.mrb[2].mxu0 }
 0x403   : > { %v1538_v41 = vmul.f32 %v1461_v40, %v2782_v37  ;;  %v2304_v42 = vpop.f32.mrb[3].mxu0 }
 0x404   : > { %v2196_v42 = vld [vmem:[%s892_s18] ss:$0 sm:$0xff] }
 0x405   : > { %v1541_v43 = vsel %vm1540_vm5, %v1538_v41, 0.0 }
 0x406   : > { %v1542_v44 = vrot.slane %v1541_v43, 4  ;;  %v1534_v45 = vpop.f32.mrb[8].mxu1 }
 0x407   : > { %v1539_v46 = vmul.f32 %v1534_v45, %v2782_v37  ;;  %v2309_v47 = vpop.f32.mrb[9].mxu1  ;;  %v2190_v37 = vld [vmem:[%s3028_s19] ss:$0 sm:$0xff] }
 0x408   : > { %v1543_v48 = vadd.f32 %v1542_v44, %v1541_v43 }
 0x409   : > { %v1548_v49 = vsel %vm1540_vm5, %v1539_v46, 0.0 }
 0x40a   : > { %v1544_v50 = vrot.slane %v1543_v48, 2  ;;  %v1549_v51 = vrot.slane %v1548_v49, 4 }
 0x40c   : > { %v1545_v52 = vadd.f32 %v1544_v50, %v1543_v48  ;;  %v1550_v53 = vadd.f32 %v1549_v51, %v1548_v49 }
 0x40e   : > { %v1551_v54 = vrot.slane %v1550_v53, 2  ;;  %v1546_v55 = vrot.slane %v1545_v52, 1 }
 0x410   : > { %v1552_v56 = vadd.f32 %v1551_v54, %v1550_v53  ;;  %v1547_v58 = vadd.f32 %v1546_v55, %v1545_v52 }
 0x412   : > { %v1553_v57 = vrot.slane %v1552_v56, 1 }
 0x414   : > { %v1554_v59 = vadd.f32 %v1553_v57, %v1552_v56  ;;  %v2198_v57 = vld [vmem:[%s895_s26] ss:$0 sm:$0xff] }
 0x416   : > { %v1586_v60 = vsel %vm1585_vm6, %v1554_v59, %v1547_v58  ;;  %v2199_v59 = vld [vmem:[%s898_s13] ss:$0 sm:$0xff] }
 0x417   : > { %2319 = vmatmul.mubr.msk.f32.vlgmr.msra.gmra.mrb[4].mxu0 %vm926_vm2, %v1586_v60 }
 0x418   : > { %2348 = vmatprep.mubr.msk.f32.mxu0 %vm2536_vm1, %v2537_v7  ;;  %2387 = vmatpush3.bf16.msra.mxu0 %v2386_v17 }
 0x419   : > { %2388 = vmatprep.subr.bf16.mxu0 %v2535_v4 }
 0x41c   : > { %2390 = vmatpush3.bf16.msra.mxu0 %v2389_v19 }
 0x41d   : > { %2391 = vmatprep.subr.bf16.mxu0 %v2535_v4 }
 0x420   : > { %2393 = vmatpush3.bf16.msra.mxu0 %v2392_v22 }
 0x421   : > { %2394 = vmatprep.subr.bf16.mxu0 %v2535_v4 }
 0x424   : > { %2396 = vmatpush3.bf16.msra.mxu0 %v2395_v35 }
 0x4ea   : > { %v1655_v61 = vpop.f32.mrb[4].mxu0 }
 0x4eb   : > { %v1656_v62 = vadd.f32 %v2190_v37, %v1655_v61  ;;  %v2320_v63 = vpop.f32.mrb[5].mxu0  ;;  %v1903_v61 = vsel (!%p2200_p6), %vm1585_vm6, %v2823_v32, %v2821_v29 }
 0x4ec   : > { %1906 = vst.msk [vmem:[#allocation5] sm:$0x3] (!%p2200_p6), %vm1905_vm9, %v1903_v61 }
 0x4ed   : > { %v1659_v0 = vadd.f32 %v1656_v62, %v2757_v15  ;;  %v1693_v15 = vld [vmem:[%s2717_s28 + $0x10] sm:$0xff] }
 0x4ee   : > { %v2383_v12 = vpack.c.bf16 %v1694_v11, %v1693_v15 }
 0x4ef   : > { %v1661_v1 = vsel %vm1660_vm7, %v1659_v0, 0.0 }
 0x4f0   : > { %1662 = vadd.xlane.f32.xlu0 %v1661_v1  ;;  %2384 = vmatpush3.bf16.msra.mxu1 %v2383_v12 }
 0x57d   : > { %v1663_v2 = vpop.xlane.xlu0 %1662 }
 0x57e   : > { %v1665_v7 = vmul.f32 0.03125, %v1663_v2 }
 0x580   : > { %v1666_v3 = vsub.f32 %v1659_v0, %v1665_v7 }
 0x582   : > { %v1667_v5 = vmul.f32 %v1666_v3, %v1666_v3 }
 0x584   : > { %v1668_v6 = vsel %vm1660_vm7, %v1667_v5, 0.0 }
 0x585   : > { %1669 = vadd.xlane.f32.xlu1 %v1668_v6 }
 0x612   : > { %v1670_v23 = vpop.xlane.xlu1 %1669 }
 0x613   : > { %v1671_v24 = vmul.f32 0.03125, %v1670_v23 }
 0x615   : > { %v1672_v25 = vadd.f32 1e-05, %v1671_v24 }
 0x617   : > { %2447 = vrsqrt.f32 %v1672_v25 }
 0x621   : > { %v2448_v26 = vpop.eup %2447 }
 0x622   : > { %v1674_v28 = vmul.f32 %v2448_v26, %v1666_v3 }
 0x624   : > { %v1682_v31 = vmul.f32 %v2192_v27, %v1674_v28 }
 0x626   : > { %v1690_v4 = vadd.f32 %v2193_v30, %v1682_v31 }
 0x628   : > { %2330 = vmatmul.mubr.msk.f32.vlgmr.msra.gmra.mrb[10].mxu1 %vm926_vm2, %v1690_v4 }
 0x6fb   : > { %v1771_v38 = vpop.f32.mrb[10].mxu1 }
 0x6fc   : > { %v1772_v39 = vadd.f32 %v2194_v36, %v1771_v38  ;;  %v2331_v40 = vpop.f32.mrb[11].mxu1 }
 0x6fe   : > { %v1775_v41 = vmax.f32 %v1772_v39, 0.0 }
 0x700   : > { %2349 = vmatmul.mubr.msk.f32.vlgmr.msra.gmra.mrb[6].mxu0 %vm1791_vm8, %v1775_v41 }
 0x7d3   : > { %v1861_v43 = vpop.f32.mrb[6].mxu0 }
 0x7d4   : > { %v1862_v44 = vadd.f32 %v2196_v42, %v1861_v43  ;;  %v2350_v45 = vpop.f32.mrb[7].mxu0 }
 0x7d6   : > { %v1865_v46 = vadd.f32 %v1862_v44, %v1690_v4 }
 0x7d8   : > { %v1866_v47 = vsel %vm1660_vm7, %v1865_v46, 0.0 }
 0x7d9   : > { %1867 = vadd.xlane.f32.xlu0 %v1866_v47 }
 0x866   : > { %v1868_v48 = vpop.xlane.xlu0 %1867 }
 0x867   : > { %v1869_v49 = vmul.f32 0.03125, %v1868_v48 }
 0x869   : > { %v1870_v50 = vsub.f32 %v1865_v46, %v1869_v49 }
 0x86b   : > { %v1871_v51 = vmul.f32 %v1870_v50, %v1870_v50 }
 0x86d   : > { %v1872_v52 = vsel %vm1660_vm7, %v1871_v51, 0.0 }
 0x86e   : > { %1873 = vadd.xlane.f32.xlu1 %v1872_v52 }
 0x8fb   : > { %v1874_v53 = vpop.xlane.xlu1 %1873 }
 0x8fc   : > { %v1875_v54 = vmul.f32 0.03125, %v1874_v53 }
 0x8fe   : > { %v1876_v55 = vadd.f32 1e-05, %v1875_v54 }
 0x900   : > { %2449 = vrsqrt.f32 %v1876_v55 }
 0x90a   : > { %v2450_v56 = vpop.eup %2449 }
 0x90b   : > { %v1878_v58 = vmul.f32 %v2450_v56, %v1870_v50  ;;  %1899 = sbr.rel (%p2200_p6) target bundleno = 2322 (0x912), region = 104 }
 0x90d   : > { %v1886_v60 = vmul.f32 %v2198_v57, %v1878_v58 }
 0x90f   : > { %v1894_v37 = vadd.f32 %v2199_v59, %v1886_v60 }
 0x911   : > { %1895 = vst.msk [vmem:[#allocation2] sm:$0x3] %vm1660_vm7, %v1894_v37  ;;  %1900 = vst.msk [vmem:[#allocation3] sm:$0x3] (!%p2200_p6), %vm1660_vm7, %v1894_v37 }
 0x912 PF: > { %s3034_s26 = sld [smem:[#allocation11_spill]]  ;;  %s2539_s25 = smov [#allocation3]  }
 0x913   : > { %s1916_s28 = sshll.u32 %s2539_s25, 4  ;;  %s2540_s20 = smov [#allocation5]   ;;  %s1917_s28 = int_to_ptr.vmem [resolvable:$true] %s1916_s28 }
 0x914   : > { %s1929_s1 = sshll.u32 %s2540_s20, 4  ;;  %s2451_s3 = scalar_lea.vmem %s1917_s28, 32  ;;  %s2906_s1 = int_to_ptr.vmem [resolvable:$true] %s1929_s1 }
 0x915   : > { %p2452_p8 = scmp.ne.s32.totalorder %s1917_s28, %s2451_s3  ;;  %p2458_p11 = scmp.lt.s32.totalorder %s1917_s28, %s1917_s28 }
 0x916   : > { %p2459_p12 = scmp.lt.s32.totalorder %s2451_s3, %s2451_s3 }
 0x918   : > { %s3035_s19 = sadd.s32 4294967295, %s3034_s26   ;;  %p2460_p13 = por %p2459_p12, %p2458_p11 }
 0x919   : > { %p2902_p7 = scmp.eq.s32.totalorder %s3035_s19, 1 }
 0x91b   : > { %p2453_p9 = pnand %p2452_p8, %p2902_p7 }
 0x91d   : > { %p2454_p10 = pneg %p2453_p9 }
 0x91f   : > { %p2461_p0 = pnand %p2460_p13, %p2454_p10 }
 0x921   : > { %2464 = shalt.err (!%p2461_p0)
}
 0x922   : > { %s3037_s0 = sld [smem:[#allocation24_spill]] }
 0x928   : > { %s2465_s24 = scalar_lea.hbm %s3037_s0, 32 }
 0x929   : > { %p2466_p1 = scmp.ne.s32.totalorder %s3037_s0, %s2465_s24  ;;  %p2471_p4 = scmp.lt.u32.totalorder %s2465_s24, %s3037_s0 }
 0x92b   : > { %p2467_p2 = pnand %p2466_p1, %p2902_p7 }
 0x92d   : > { %p2468_p3 = pneg %p2467_p2 }
 0x92f   : > { %p2473_p5 = pnand %p2471_p4, %p2468_p3 }
 0x931   : > { %2476 = shalt.err (!%p2473_p5)
}
 0x932   : > { %2398 = dma.vmem_to_hbm [thread:$0]  (%p2902_p7), %s1917_s28, 32, %s3037_s0, [#allocation4]  }
 0x933   : > { %s2477_s2 = scalar_lea.vmem %s2906_s1, 32  ;;  %p2484_p10 = scmp.lt.s32.totalorder %s2906_s1, %s2906_s1 }
 0x934   : > { %p2478_p6 = scmp.ne.s32.totalorder %s2906_s1, %s2477_s2  ;;  %p2485_p11 = scmp.lt.s32.totalorder %s2477_s2, %s2477_s2 }
 0x936   : > { %p2479_p8 = pnand %p2478_p6, %p2902_p7  ;;  %p2486_p12 = por %p2485_p11, %p2484_p10 }
 0x938   : > { %p2480_p9 = pneg %p2479_p8 }
 0x93a   : > { %p2487_p13 = pnand %p2486_p12, %p2480_p9 }
 0x93c   : > { %2490 = shalt.err (!%p2487_p13)
}
 0x93d   : > { %s3038_s26 = sld [smem:[#allocation25_spill]] }
 0x943   : > { %s2491_s19 = scalar_lea.hbm %s3038_s26, 32 }
 0x944   : > { %p2492_p0 = scmp.ne.s32.totalorder %s3038_s26, %s2491_s19  ;;  %p2497_p3 = scmp.lt.u32.totalorder %s2491_s19, %s3038_s26 }
 0x946   : > { %p2493_p1 = pnand %p2492_p0, %p2902_p7 }
 0x948   : > { %p2494_p2 = pneg %p2493_p1 }
 0x94a   : > { %p2499_p4 = pnand %p2497_p3, %p2494_p2 }
 0x94c   : > { %2502 = shalt.err (!%p2499_p4)
}
 0x94d   : > { %2400 = dma.vmem_to_hbm [thread:$0]  (%p2902_p7), %s2906_s1, 32, %s3038_s26, [#allocation6]  }
 0x94e   : > { %2516 = dma.done.wait (%p2902_p7), [#allocation4], 32  }
 0x94f   : > { %2518 = vsyncadd (%p2902_p7), [#allocation4], 4294967264 }
 0x950   : > { %2520 = dma.done.wait (%p2902_p7), [#allocation6], 32  }
 0x951   : > { %2522 = vsyncadd (%p2902_p7), [#allocation6], 4294967264 }
 0x952 PF: > { %s3039_s24 = sld [smem:[#allocation11_spill]]  ;;  %s3040_s1 = sld [smem:[#allocation10_spill]] }
 0x953   : > { %s3041_s22 = sld [smem:[#allocation12_spill]] }
 0x958   : > { %s33_s23 = sadd.s32 1, %s3039_s24  }
 0x959   : > { %p30_p5 = scmp.ge.s32.totalorder %s33_s23, 4  }
 0x95b   :  { %32 = sbr.rel (!%p30_p5) target bundleno = 16 (0x10), region = 189 }
 0x962   :  { %1946 = vsyncpa [#allocation4], 1 }
 0x963   :  { %1948 = vsyncpa [#allocation4 + $0x1], 1 }
 0x964   :  { %1949 = vsyncpa [#allocation6], 1 }

</bundles_post_ra>
